<compile_context>
chip_gen: v6e
topology: v6e:2x2x1
jax: 0.10.0
libtpu: 0.0.40
codegen_flags: <defaults>
</compile_context>

<pallas_src>
import functools

import jax
import jax.numpy as jnp
from jax.experimental import pallas as pl
from jax.experimental.pallas import tpu as pltpu

EPS = 1e-5


# --------------------------------------------------------------------- utils


def _vmem_capacity_bytes():
    """Physical per-core VMEM; conservative default if the query fails."""
    try:
        return int(pltpu.get_tpu_info().vmem_capacity_bytes)
    except Exception:
        return 64 << 20  # v7x per-TensorCore VMEM (smallest current gen)


def _compiler_params(sem, need_bytes, capacity):
    """Generation-aware VMEM limit: up to ~75% of physical (~96 MiB on
    v5e/v6e, ~48 MiB on v7x), floor 16 MiB, never far above what is needed."""
    cap = max(int(capacity) * 3 // 4, 16 << 20)
    limit = int(min(max(int(need_bytes) + (4 << 20), 16 << 20), cap))
    return pltpu.CompilerParams(dimension_semantics=sem, vmem_limit_bytes=limit)


def _pick_hw_tile(rows, hw, target_block_bytes):
    """Lane-axis tile for elementwise passes: multiple of 128 (or full HW)."""
    per_col = 4 * max(int(rows), 1)
    t = max(int(target_block_bytes) // per_col, 128)
    if t >= hw:
        return hw
    return max(128, (t // 128) * 128)


# ------------------------------------------------------------------- kernels


def _make_stats_kernel(t_hw, hw):
    """Pass 1: accumulate per-(n, c) sum / sumsq over the HW grid axis."""
    rem = hw % t_hw  # valid lanes in the last (partial) HW tile; 0 if exact

    def kernel(x_ref, sum_ref, sq_ref):
        h = pl.program_id(1)
        x = x_ref[0].astype(jnp.float32)                        # (rows, t_hw)

        if rem:
            # Mask padded lanes of the final partial tile so they never feed
            # the reductions (out-of-bounds block reads return junk).
            last = pl.num_programs(1) - 1
            col = jax.lax.broadcasted_iota(jnp.int32, x.shape, 1)
            limit = jnp.where(h == last, rem, t_hw)
            x = jnp.where(col < limit, x, 0.0)

        @pl.when(h == 0)
        def _init():
            sum_ref[...] = jnp.zeros_like(sum_ref)
            sq_ref[...] = jnp.zeros_like(sq_ref)

        sum_ref[0] += jnp.sum(x, axis=-1, keepdims=True)        # (rows, 1)
        sq_ref[0] += jnp.sum(x * x, axis=-1, keepdims=True)

    return kernel


def _make_fused_norm_kernel(c_in):
    """Pass 2 (fast path): per-sample IN stats + normalize, BN affine apply."""

    def kernel(x_ref, g_in_ref, b_in_ref, bn_sc_ref, bn_sh_ref, o_ref):
        hw = x_ref.shape[-1]
        inv_hw = 1.0 / float(hw)

        # Instance-norm half: single-pass sum/sumsq (no centered temporary),
        # folded with gamma/beta into per-(n, c) scale & shift.
        x_in = x_ref[0, :c_in, :].astype(jnp.float32)            # (c_in, HW)
        s = jnp.sum(x_in, axis=-1, keepdims=True)
        sq = jnp.sum(x_in * x_in, axis=-1, keepdims=True)
        mean = s * inv_hw
        var = jnp.maximum(sq * inv_hw - mean * mean, 0.0)         # biased
        sc = g_in_ref[...] * jax.lax.rsqrt(var + EPS)
        sh = b_in_ref[...] - mean * sc
        o_ref[0, :c_in, :] = (x_in * sc + sh).astype(o_ref.dtype)

        # Batch-norm half: per-channel scale/shift precomputed in the wrapper.
        x_bn = x_ref[0, c_in:, :].astype(jnp.float32)             # (c_bn, HW)
        o_ref[0, c_in:, :] = (x_bn * bn_sc_ref[...] + bn_sh_ref[...]
                              ).astype(o_ref.dtype)

    return kernel


def _elementwise_norm_kernel(x_ref, scale_ref, shift_ref, o_ref):
    """Pass 2 (fallback): y = x * scale + shift with per-(n, c) scale/shift."""
    x = x_ref[0].astype(jnp.float32)                              # (C, t_hw)
    o_ref[0] = (x * scale_ref[0] + shift_ref[0]).astype(o_ref.dtype)


# ------------------------------------------------------------------- forward


def ibn_forward(x, params, half, *, vmem_budget_bytes=None):
    """IBN forward. x: (N, C, H, W) float32 NCHW -> (N, C, H, W)."""
    N, C, H, W = x.shape
    c_in = int(half)
    c_bn = C - c_in
    assert 0 < c_in < C, "IBN kernel expects both an IN half and a BN half"
    HW = H * W

    x3 = x.reshape(N, C, HW)  # contiguous reshape, no data movement

    gamma_in = params["in_weight"].astype(jnp.float32).reshape(c_in, 1)
    beta_in = params["in_bias"].astype(jnp.float32).reshape(c_in, 1)
    gamma_bn = params["bn_weight"].astype(jnp.float32).reshape(c_bn, 1)
    beta_bn = params["bn_bias"].astype(jnp.float32).reshape(c_bn, 1)

    capacity = _vmem_capacity_bytes()
    budget = int(vmem_budget_bytes) if vmem_budget_bytes else capacity * 3 // 4

    # Fast path: the whole (1, C, HW) sample block (in + out, double-buffered,
    # plus f32 temporaries) stays resident in VMEM for the fused pass 2.
    fused = 6 * C * HW * 4 <= budget
    # Pass 1 reads only the BN half when the channel split is sublane-aligned
    # and block-index addressable (true for ratio=0.5 with planes % 16 == 0);
    # otherwise it reads all C rows and the wrapper slices the BN part out.
    bn_only = fused and (c_bn % 8 == 0) and (c_in % c_bn == 0)
    rows = c_bn if bn_only else C
    c_blk_off = (c_in // c_bn) if bn_only else 0

    # ---------------- Pass 1: per-(n, c) sum / sumsq over HW ----------------
    if fused:
        t1 = HW                        # whole-sample rows already fit VMEM
    else:
        max_cols = max(budget // (6 * rows * 4), 128)
        t1 = HW if HW <= max_cols else max(128, (max_cols // 128) * 128)
    n1 = pl.cdiv(HW, t1)

    sums, sqs = pl.pallas_call(
        _make_stats_kernel(t1, HW),
        grid=(N, n1),
        in_specs=[pl.BlockSpec((1, rows, t1), lambda n, h: (n, c_blk_off, h))],
        out_specs=[
            pl.BlockSpec((1, rows, 1), lambda n, h: (n, 0, 0)),
            pl.BlockSpec((1, rows, 1), lambda n, h: (n, 0, 0)),
        ],
        out_shape=(
            jax.ShapeDtypeStruct((N, rows, 1), jnp.float32),
            jax.ShapeDtypeStruct((N, rows, 1), jnp.float32),
        ),
        compiler_params=_compiler_params(("parallel", "arbitrary"),
                                         4 * rows * t1 * 4, capacity),
    )(x3)

    # ------ BatchNorm half: fold batch stats into per-channel scale/shift ---
    bn_sum = sums if bn_only else sums[:, c_in:]
    bn_sq = sqs if bn_only else sqs[:, c_in:]
    inv_nhw = 1.0 / float(N * HW)
    bn_mean = jnp.sum(bn_sum, axis=0) * inv_nhw                   # (c_bn, 1)
    bn_var = jnp.maximum(
        jnp.sum(bn_sq, axis=0) * inv_nhw - bn_mean * bn_mean, 0.0)
    bn_scale = gamma_bn * jax.lax.rsqrt(bn_var + EPS)
    bn_shift = beta_bn - bn_mean * bn_scale
    # TODO(synk): BatchNorm running-stat (momentum) updates are stateful
    # module bookkeeping and are intentionally not produced here.

    # ---------------- Pass 2: normalize -------------------------------------
    if fused:
        y = pl.pallas_call(
            _make_fused_norm_kernel(c_in),
            grid=(N,),
            in_specs=[
                pl.BlockSpec((1, C, HW), lambda n: (n, 0, 0)),
                pl.BlockSpec((c_in, 1), lambda n: (0, 0)),
                pl.BlockSpec((c_in, 1), lambda n: (0, 0)),
                pl.BlockSpec((c_bn, 1), lambda n: (0, 0)),
                pl.BlockSpec((c_bn, 1), lambda n: (0, 0)),
            ],
            out_specs=pl.BlockSpec((1, C, HW), lambda n: (n, 0, 0)),
            out_shape=jax.ShapeDtypeStruct((N, C, HW), x.dtype),
            compiler_params=_compiler_params(("parallel",), 6 * C * HW * 4,
                                             capacity),
        )(x3, gamma_in, beta_in, bn_scale, bn_shift)
    else:
        # Fold per-(n, c) scale/shift (tiny arrays) for the elementwise pass.
        inv_hw = 1.0 / float(HW)
        in_mean = sums[:, :c_in] * inv_hw                         # (N, c_in, 1)
        in_var = jnp.maximum(sqs[:, :c_in] * inv_hw - in_mean * in_mean, 0.0)
        in_scale = gamma_in * jax.lax.rsqrt(in_var + EPS)
        in_shift = beta_in - in_mean * in_scale
        scale = jnp.concatenate(
            [in_scale, jnp.broadcast_to(bn_scale[None], (N, c_bn, 1))], axis=1)
        shift = jnp.concatenate(
            [in_shift, jnp.broadcast_to(bn_shift[None], (N, c_bn, 1))], axis=1)

        t2 = _pick_hw_tile(C, HW, budget // 8)
        n2 = pl.cdiv(HW, t2)
        y = pl.pallas_call(
            _elementwise_norm_kernel,
            grid=(N, n2),
            in_specs=[
                pl.BlockSpec((1, C, t2), lambda n, h: (n, 0, h)),
                pl.BlockSpec((1, C, 1), lambda n, h: (n, 0, 0)),
                pl.BlockSpec((1, C, 1), lambda n, h: (n, 0, 0)),
            ],
            out_specs=pl.BlockSpec((1, C, t2), lambda n, h: (n, 0, h)),
            out_shape=jax.ShapeDtypeStruct((N, C, HW), x.dtype),
            compiler_params=_compiler_params(("parallel", "parallel"),
                                             4 * C * t2 * 4, capacity),
        )(x3, scale, shift)

    return y.reshape(N, C, H, W)


# --------------------------------------------------------------- params / ref


def init_ibn_params(key, planes, ratio=0.5):
    half = int(planes * ratio)
    c_bn = planes - half
    k1, k2, k3, k4 = jax.random.split(key, 4)
    # Deterministic perturbation of PyTorch's default (weight=1, bias=0) init
    # so the affine paths are actually exercised.
    params = {
        "in_weight": 1.0 + 0.1 * jax.random.normal(k1, (half,), jnp.float32),
        "in_bias": 0.1 * jax.random.normal(k2, (half,), jnp.float32),
        "bn_weight": 1.0 + 0.1 * jax.random.normal(k3, (c_bn,), jnp.float32),
        "bn_bias": 0.1 * jax.random.normal(k4, (c_bn,), jnp.float32),
    }
    return params, half


def _reference(x, params, half):
    """Pure-JAX reference matching PyTorch IBN forward (train mode)."""
    x_in, x_bn = x[:, :half], x[:, half:]
    m = jnp.mean(x_in, axis=(2, 3), keepdims=True)
    v = jnp.mean((x_in - m) ** 2, axis=(2, 3), keepdims=True)
    o1 = (x_in - m) / jnp.sqrt(v + EPS)
    o1 = (o1 * params["in_weight"][None, :, None, None]
          + params["in_bias"][None, :, None, None])
    m = jnp.mean(x_bn, axis=(0, 2, 3), keepdims=True)
    v = jnp.mean((x_bn - m) ** 2, axis=(0, 2, 3), keepdims=True)
    o2 = (x_bn - m) / jnp.sqrt(v + EPS)
    o2 = (o2 * params["bn_weight"][None, :, None, None]
          + params["bn_bias"][None, :, None, None])
    return jnp.concatenate([o1, o2], axis=1)


if __name__ == "__main__":
    key = jax.random.PRNGKey(0)

    # (N, planes, H, W, vmem_budget_override) -- the override only shrinks the
    # tiling budget so the HW-tiled fallback path is exercised at a small size.
    cases = [
        (2, 4, 16, 16, None),       # module example size -> fused pass-2 path
        (2, 32, 16, 16, None),      # 8-aligned split -> BN-only pass-1 reads
        (2, 4, 18, 18, 16 << 10),   # tiny budget -> HW-tiled fallback path
    ]
    for idx, (N, C, H, W, budget) in enumerate(cases):
        kx, kp = jax.random.split(jax.random.fold_in(key, idx))
        x = jax.random.normal(kx, (N, C, H, W), jnp.float32)
        params, half = init_ibn_params(kp, planes=C, ratio=0.5)

        fwd = jax.jit(functools.partial(ibn_forward, half=half,
                                        vmem_budget_bytes=budget))
        out = jax.block_until_ready(fwd(x, params))

        ref = _reference(x, params, half)
        assert out.shape == (N, C, H, W)
        assert jnp.allclose(out, ref, atol=1e-4, rtol=1e-4), \
            f"mismatch vs reference (case {idx})"

    print("KERNEL_OK")
</pallas_src>

<mosaic_0001>
module attributes {stable_mosaic.version = 11 : i64} {
  func.func @kernel(%arg0: i32, %arg1: i32, %arg2: memref<1x4x256xf32, #tpu.memory_space<vmem>>, %arg3: memref<1x4x1xf32, #tpu.memory_space<vmem>>, %arg4: memref<1x4x1xf32, #tpu.memory_space<vmem>>) attributes {dimension_semantics = [#tpu.dimension_semantics<parallel>, #tpu.dimension_semantics<arbitrary>], iteration_bounds = array<i64: 2, 1>, scalar_prefetch = 0 : i64, scratch_operands = 0 : i64, tpu.core_type = #tpu.core_type<tc>, window_params = [{transform_indices = @transform_0, window_bounds = array<i64: 1, 4, 256>}, {transform_indices = @transform_1, window_bounds = array<i64: 1, 4, 1>}, {transform_indices = @transform_2, window_bounds = array<i64: 1, 4, 1>}]} {
    %c0 = arith.constant 0 : index
    %c0_0 = arith.constant 0 : index
    %c0_1 = arith.constant 0 : index
    %0 = vector.load %arg2[%c0, %c0_0, %c0_1] : memref<1x4x256xf32, #tpu.memory_space<vmem>>, vector<1x4x256xf32>
    %1 = vector.shape_cast %0 : vector<1x4x256xf32> to vector<4x256xf32>
    %c0_i32 = arith.constant 0 : i32
    %2 = arith.cmpi eq, %arg1, %c0_i32 : i32
    %3 = arith.extui %2 : i1 to i32
    %c0_i32_2 = arith.constant 0 : i32
    %4 = arith.cmpi ne, %3, %c0_i32_2 : i32
    scf.if %4 {
      %cst_16 = arith.constant 0.000000e+00 : f32
      %22 = vector.broadcast %cst_16 : f32 to vector<1x4x1xf32>
      %c0_17 = arith.constant 0 : index
      %c0_18 = arith.constant 0 : index
      %c0_19 = arith.constant 0 : index
      %23 = vector.load %arg3[%c0_17, %c0_18, %c0_19] : memref<1x4x1xf32, #tpu.memory_space<vmem>>, vector<1x4x1xf32>
      tpu.vector_store %arg3[%c0_17, %c0_18, %c0_19], %22 {strides = array<i32>} : memref<1x4x1xf32, #tpu.memory_space<vmem>>, vector<1x4x1xf32>,
      %cst_20 = arith.constant 0.000000e+00 : f32
      %24 = vector.broadcast %cst_20 : f32 to vector<1x4x1xf32>
      %c0_21 = arith.constant 0 : index
      %c0_22 = arith.constant 0 : index
      %c0_23 = arith.constant 0 : index
      %25 = vector.load %arg4[%c0_21, %c0_22, %c0_23] : memref<1x4x1xf32, #tpu.memory_space<vmem>>, vector<1x4x1xf32>
      tpu.vector_store %arg4[%c0_21, %c0_22, %c0_23], %24 {strides = array<i32>} : memref<1x4x1xf32, #tpu.memory_space<vmem>>, vector<1x4x1xf32>,
    } else {
    }
    %c0_3 = arith.constant 0 : index
    %c0_4 = arith.constant 0 : index
    %c0_5 = arith.constant 0 : index
    %5 = vector.load %arg3[%c0_3, %c0_4, %c0_5] : memref<1x4x1xf32, #tpu.memory_space<vmem>>, vector<1x4x1xf32>
    %6 = vector.shape_cast %5 : vector<1x4x1xf32> to vector<4x1xf32>
    %cst = arith.constant dense<0.000000e+00> : vector<4xf32>
    %7 = vector.multi_reduction <add>, %1, %cst [1] : vector<4x256xf32> to vector<4xf32>
    %8 = vector.shape_cast %7 : vector<4xf32> to vector<4x1xf32>
    %9 = arith.addf %6, %8 : vector<4x1xf32>
    %c0_6 = arith.constant 0 : index
    %c0_7 = arith.constant 0 : index
    %c0_8 = arith.constant 0 : index
    %10 = vector.load %arg3[%c0_6, %c0_7, %c0_8] : memref<1x4x1xf32, #tpu.memory_space<vmem>>, vector<1x4x1xf32>
    %11 = vector.shape_cast %10 : vector<1x4x1xf32> to vector<4x1xf32>
    %12 = vector.shape_cast %9 : vector<4x1xf32> to vector<1x4x1xf32>
    tpu.vector_store %arg3[%c0_6, %c0_7, %c0_8], %12 {strides = array<i32>} : memref<1x4x1xf32, #tpu.memory_space<vmem>>, vector<1x4x1xf32>,
    %c0_9 = arith.constant 0 : index
    %c0_10 = arith.constant 0 : index
    %c0_11 = arith.constant 0 : index
    %13 = vector.load %arg4[%c0_9, %c0_10, %c0_11] : memref<1x4x1xf32, #tpu.memory_space<vmem>>, vector<1x4x1xf32>
    %14 = vector.shape_cast %13 : vector<1x4x1xf32> to vector<4x1xf32>
    %15 = arith.mulf %1, %1 : vector<4x256xf32>
    %cst_12 = arith.constant dense<0.000000e+00> : vector<4xf32>
    %16 = vector.multi_reduction <add>, %15, %cst_12 [1] : vector<4x256xf32> to vector<4xf32>
    %17 = vector.shape_cast %16 : vector<4xf32> to vector<4x1xf32>
    %18 = arith.addf %14, %17 : vector<4x1xf32>
    %c0_13 = arith.constant 0 : index
    %c0_14 = arith.constant 0 : index
    %c0_15 = arith.constant 0 : index
    %19 = vector.load %arg4[%c0_13, %c0_14, %c0_15] : memref<1x4x1xf32, #tpu.memory_space<vmem>>, vector<1x4x1xf32>
    %20 = vector.shape_cast %19 : vector<1x4x1xf32> to vector<4x1xf32>
    %21 = vector.shape_cast %18 : vector<4x1xf32> to vector<1x4x1xf32>
    tpu.vector_store %arg4[%c0_13, %c0_14, %c0_15], %21 {strides = array<i32>} : memref<1x4x1xf32, #tpu.memory_space<vmem>>, vector<1x4x1xf32>,
    return
  }
  func.func @transform_0(%arg0: i32, %arg1: i32) -> (i32, i32, i32) {
    %c0_i32 = arith.constant 0 : i32
    %c0_i32_0 = arith.constant 0 : i32
    return %arg0, %c0_i32, %arg1 : i32, i32, i32
  }
  func.func @transform_1(%arg0: i32, %arg1: i32) -> (i32, i32, i32) {
    %c0_i32 = arith.constant 0 : i32
    %c0_i32_0 = arith.constant 0 : i32
    %c0_i32_1 = arith.constant 0 : i32
    return %arg0, %c0_i32, %c0_i32_0 : i32, i32, i32
  }
  func.func @transform_2(%arg0: i32, %arg1: i32) -> (i32, i32, i32) {
    %c0_i32 = arith.constant 0 : i32
    %c0_i32_0 = arith.constant 0 : i32
    %c0_i32_1 = arith.constant 0 : i32
    return %arg0, %c0_i32, %c0_i32_0 : i32, i32, i32
  }
}

module attributes {stable_mosaic.version = 11 : i64} {
  func.func @kernel(%arg0: i32, %arg1: memref<1x4x256xf32, #tpu.memory_space<vmem>>, %arg2: memref<2x1xf32, #tpu.memory_space<vmem>>, %arg3: memref<2x1xf32, #tpu.memory_space<vmem>>, %arg4: memref<2x1xf32, #tpu.memory_space<vmem>>, %arg5: memref<2x1xf32, #tpu.memory_space<vmem>>, %arg6: memref<1x4x256xf32, #tpu.memory_space<vmem>>) attributes {dimension_semantics = [#tpu.dimension_semantics<parallel>], iteration_bounds = array<i64: 2>, scalar_prefetch = 0 : i64, scratch_operands = 0 : i64, tpu.core_type = #tpu.core_type<tc>, window_params = [{transform_indices = @transform_0, window_bounds = array<i64: 1, 4, 256>}, {pipeline_mode = #tpu.pipeline_mode<synchronous>, transform_indices = @transform_1, window_bounds = array<i64: 2, 1>}, {pipeline_mode = #tpu.pipeline_mode<synchronous>, transform_indices = @transform_2, window_bounds = array<i64: 2, 1>}, {pipeline_mode = #tpu.pipeline_mode<synchronous>, transform_indices = @transform_3, window_bounds = array<i64: 2, 1>}, {pipeline_mode = #tpu.pipeline_mode<synchronous>, transform_indices = @transform_4, window_bounds = array<i64: 2, 1>}, {transform_indices = @transform_5, window_bounds = array<i64: 1, 4, 256>}]} {
    %c0 = arith.constant 0 : index
    %c0_0 = arith.constant 0 : index
    %c0_1 = arith.constant 0 : index
    %0 = vector.load %arg1[%c0, %c0_0, %c0_1] : memref<1x4x256xf32, #tpu.memory_space<vmem>>, vector<1x2x256xf32>
    %1 = vector.shape_cast %0 : vector<1x2x256xf32> to vector<2x256xf32>
    %cst = arith.constant dense<0.000000e+00> : vector<2xf32>
    %2 = vector.multi_reduction <add>, %1, %cst [1] : vector<2x256xf32> to vector<2xf32>
    %3 = vector.shape_cast %2 : vector<2xf32> to vector<2x1xf32>
    %4 = arith.mulf %1, %1 : vector<2x256xf32>
    %cst_2 = arith.constant dense<0.000000e+00> : vector<2xf32>
    %5 = vector.multi_reduction <add>, %4, %cst_2 [1] : vector<2x256xf32> to vector<2xf32>
    %6 = vector.shape_cast %5 : vector<2xf32> to vector<2x1xf32>
    %cst_3 = arith.constant 3.906250e-03 : f32
    %7 = vector.broadcast %cst_3 : f32 to vector<2x1xf32>
    %8 = arith.mulf %3, %7 : vector<2x1xf32>
    %cst_4 = arith.constant 3.906250e-03 : f32
    %9 = vector.broadcast %cst_4 : f32 to vector<2x1xf32>
    %10 = arith.mulf %6, %9 : vector<2x1xf32>
    %11 = arith.mulf %8, %8 : vector<2x1xf32>
    %12 = arith.subf %10, %11 : vector<2x1xf32>
    %cst_5 = arith.constant 0.000000e+00 : f32
    %13 = vector.broadcast %cst_5 : f32 to vector<2x1xf32>
    %14 = arith.maximumf %12, %13 : vector<2x1xf32>
    %c0_6 = arith.constant 0 : index
    %c0_7 = arith.constant 0 : index
    %15 = vector.load %arg2[%c0_6, %c0_7] : memref<2x1xf32, #tpu.memory_space<vmem>>, vector<2x1xf32>
    %cst_8 = arith.constant 9.99999974E-6 : f32
    %16 = vector.broadcast %cst_8 : f32 to vector<2x1xf32>
    %17 = arith.addf %14, %16 : vector<2x1xf32>
    %18 = math.rsqrt %17 : vector<2x1xf32>
    %19 = arith.mulf %15, %18 : vector<2x1xf32>
    %c0_9 = arith.constant 0 : index
    %c0_10 = arith.constant 0 : index
    %20 = vector.load %arg3[%c0_9, %c0_10] : memref<2x1xf32, #tpu.memory_space<vmem>>, vector<2x1xf32>
    %21 = arith.mulf %8, %19 : vector<2x1xf32>
    %22 = arith.subf %20, %21 : vector<2x1xf32>
    %23 = vector.broadcast %19 : vector<2x1xf32> to vector<2x256xf32>
    %24 = arith.mulf %1, %23 : vector<2x256xf32>
    %25 = vector.broadcast %22 : vector<2x1xf32> to vector<2x256xf32>
    %26 = arith.addf %24, %25 : vector<2x256xf32>
    %c0_11 = arith.constant 0 : index
    %c0_12 = arith.constant 0 : index
    %c0_13 = arith.constant 0 : index
    %27 = vector.load %arg6[%c0_11, %c0_12, %c0_13] : memref<1x4x256xf32, #tpu.memory_space<vmem>>, vector<1x2x256xf32>
    %28 = vector.shape_cast %27 : vector<1x2x256xf32> to vector<2x256xf32>
    %29 = vector.shape_cast %26 : vector<2x256xf32> to vector<1x2x256xf32>
    tpu.vector_store %arg6[%c0_11, %c0_12, %c0_13], %29 {strides = array<i32>} : memref<1x4x256xf32, #tpu.memory_space<vmem>>, vector<1x2x256xf32>,
    %c0_14 = arith.constant 0 : index
    %c2 = arith.constant 2 : index
    %c0_15 = arith.constant 0 : index
    %30 = vector.load %arg1[%c0_14, %c2, %c0_15] : memref<1x4x256xf32, #tpu.memory_space<vmem>>, vector<1x2x256xf32>
    %31 = vector.shape_cast %30 : vector<1x2x256xf32> to vector<2x256xf32>
    %c0_16 = arith.constant 0 : index
    %c0_17 = arith.constant 0 : index
    %32 = vector.load %arg4[%c0_16, %c0_17] : memref<2x1xf32, #tpu.memory_space<vmem>>, vector<2x1xf32>
    %33 = vector.broadcast %32 : vector<2x1xf32> to vector<2x256xf32>
    %34 = arith.mulf %31, %33 : vector<2x256xf32>
    %c0_18 = arith.constant 0 : index
    %c0_19 = arith.constant 0 : index
    %35 = vector.load %arg5[%c0_18, %c0_19] : memref<2x1xf32, #tpu.memory_space<vmem>>, vector<2x1xf32>
    %36 = vector.broadcast %35 : vector<2x1xf32> to vector<2x256xf32>
    %37 = arith.addf %34, %36 : vector<2x256xf32>
    %c0_20 = arith.constant 0 : index
    %c2_21 = arith.constant 2 : index
    %c0_22 = arith.constant 0 : index
    %38 = vector.load %arg6[%c0_20, %c2_21, %c0_22] : memref<1x4x256xf32, #tpu.memory_space<vmem>>, vector<1x2x256xf32>
    %39 = vector.shape_cast %38 : vector<1x2x256xf32> to vector<2x256xf32>
    %40 = vector.shape_cast %37 : vector<2x256xf32> to vector<1x2x256xf32>
    tpu.vector_store %arg6[%c0_20, %c2_21, %c0_22], %40 {strides = array<i32>} : memref<1x4x256xf32, #tpu.memory_space<vmem>>, vector<1x2x256xf32>,
    return
  }
  func.func @transform_0(%arg0: i32) -> (i32, i32, i32) {
    %c0_i32 = arith.constant 0 : i32
    %c0_i32_0 = arith.constant 0 : i32
    %c0_i32_1 = arith.constant 0 : i32
    return %arg0, %c0_i32, %c0_i32_0 : i32, i32, i32
  }
  func.func @transform_1(%arg0: i32) -> (i32, i32) {
    %c0_i32 = arith.constant 0 : i32
    %c0_i32_0 = arith.constant 0 : i32
    %c0_i32_1 = arith.constant 0 : i32
    return %c0_i32, %c0_i32_0 : i32, i32
  }
  func.func @transform_2(%arg0: i32) -> (i32, i32) {
    %c0_i32 = arith.constant 0 : i32
    %c0_i32_0 = arith.constant 0 : i32
    %c0_i32_1 = arith.constant 0 : i32
    return %c0_i32, %c0_i32_0 : i32, i32
  }
  func.func @transform_3(%arg0: i32) -> (i32, i32) {
    %c0_i32 = arith.constant 0 : i32
    %c0_i32_0 = arith.constant 0 : i32
    %c0_i32_1 = arith.constant 0 : i32
    return %c0_i32, %c0_i32_0 : i32, i32
  }
  func.func @transform_4(%arg0: i32) -> (i32, i32) {
    %c0_i32 = arith.constant 0 : i32
    %c0_i32_0 = arith.constant 0 : i32
    %c0_i32_1 = arith.constant 0 : i32
    return %c0_i32, %c0_i32_0 : i32, i32
  }
  func.func @transform_5(%arg0: i32) -> (i32, i32, i32) {
    %c0_i32 = arith.constant 0 : i32
    %c0_i32_0 = arith.constant 0 : i32
    %c0_i32_1 = arith.constant 0 : i32
    return %arg0, %c0_i32, %c0_i32_0 : i32, i32, i32
  }
}

</mosaic_0001>

<bundles_post_ra>
// kernel: ibn_forward.2
= control target key start
LH: loop header
LB: loop body
LE: loop exit
PB: predicated region body
PF: predicated region fallthrough
CT: control target
= control target key end

     0   :  { %s390_s9 = smov 0   ;;  %s392_s10 = smov 0   ;;  %s430_s0 = inlined_call_operand.vmem [shape: f32[2,4,256], index: 0, kind: input, shape index: {}]   ;;  %s431_s1 = inlined_call_operand.vmem [shape: f32[2,4,1], index: 1, kind: output, shape index: {0}]   ;;  %s432_s2 = inlined_call_operand.vmem [shape: f32[2,4,1], index: 2, kind: output, shape index: {1}]  }
   0x1   :  { %s394_s11 = smov 0  }
   0x2 LB: > { %s25_s12 = sadd.s32 1, %s368_s10  ;;  %p316_p0 = scmp.ge.s32.totalorder %s372_s11, 1  ;;  %s372_s11 = sphi %s394_s11, %s13_s11   ;;  %s368_s10 = sphi %s392_s10, %s434_s10   ;;  %s364_s9 = sphi %s390_s9, %s433_s9  }
   0x3   : > { %p27_p1 = scmp.ge.s32.totalorder %s25_s12, 2  ;;  %p134_p2 = scmp.lt.s32.totalorder %s372_s11, 3 }
   0x5   : > { %s436_s12 = smov (%p27_p1, %s25_s12), 0  ;;  %p135_p3 = pnand %p316_p0, %p134_p2 }
   0x6   : > { %p164_p4 = scmp.lt.s32.totalorder (!%p135_p3), %s364_s9, 1 }
   0x7   : > { %138 = sbr.rel (%p135_p3) target bundleno = 166 (0xa6), region = 24 }
   0xc   : > { %s438_s9 = smov (!%p164_p4, %s364_s9), 1  ;;  %vm186_vm0 = vcmask 3072   ;;  %vm193_vm1 = vcmask 1043456   ;;  %v374_v1 = vmov 0.0  }
   0xd   : > { %s323_s13 = sshll.u32 %s438_s9, 3  ;;  %s319_s14 = sshll.u32 %s438_s9, 2 }
   0xe   : > { %s171_s17 = scalar_lea.vmem %s430_s0, %s323_s13  ;;  %s176_s20 = scalar_lea.vmem %s431_s1, %s319_s14 }
   0xf   : > { %v181_v0 = vld [vmem:[%s171_s17] sm:$0xff]  ;;  %187 = vst.msk [vmem:[%s176_s20] sm:$0xf] %vm186_vm0, %v374_v1  ;;  %s180_s23 = scalar_lea.vmem %s432_s2, %s319_s14 }
  0x10   : > { %v191_v2 = vcombine.high %v181_v0, %v181_v0  ;;  %v194_v3 = vsel %vm193_vm1, %v181_v0, 0.0  ;;  %v203_v4 = vmul.f32 %v181_v0, %v181_v0  ;;  %188 = vst.msk [vmem:[%s180_s23] sm:$0xf] %vm186_vm0, %v374_v1 }
  0x12   : > { %v195_v5 = vsel %vm193_vm1, %v191_v2, 0.0  ;;  %v205_v6 = vcombine.high %v203_v4, %v203_v4  ;;  %v207_v7 = vsel %vm193_vm1, %v203_v4, 0.0 }
  0x13   : > { %v196_v8 = vadd.f32 %v195_v5, %v194_v3 }
  0x14   : > { %v208_v9 = vsel %vm193_vm1, %v205_v6, 0.0 }
  0x15   : > { %197 = vadd.xlane.f32.xlu0 %v196_v8  ;;  %v209_v10 = vadd.f32 %v208_v9, %v207_v7 }
  0x16   : > { %v189_v11 = vld [vmem:[%s176_s20] sm:$0xf] }
  0x17   : > { %v202_v14 = vld [vmem:[%s180_s23] sm:$0xf] }
  0x19   : > { %210 = vadd.xlane.f32.xlu0 %v209_v10 }
  0x9e   : > { %v198_v12 = vpop.xlane.xlu0 %197 }
  0x9f   : > { %v199_v13 = vadd.f32 %v198_v12, %v189_v11 }
  0xa1   : > { %201 = vst.msk [vmem:[%s176_s20] sm:$0xf] %vm186_vm0, %v199_v13 }
  0xa2   : > { %v211_v15 = vpop.xlane.xlu0 %210 }
  0xa3   : > { %v212_v16 = vadd.f32 %v211_v15, %v202_v14 }
  0xa5   : > { %213 = vst.msk [vmem:[%s180_s23] sm:$0xf] %vm186_vm0, %v212_v16 }
  0xa6 PF: > { %s13_s11 = sadd.s32 1, %s372_s11   ;;  %s433_s9 = smov %s368_s10 }
  0xa7   : > { %p10_p5 = scmp.ge.s32.totalorder %s13_s11, 4   ;;  %s434_s10 = smov %s436_s12 }
  0xa9   :  { %12 = sbr.rel (!%p10_p5) target bundleno = 2 (0x2), region = 70 }

// kernel: ibn_forward.3
= control target key start
LH: loop header
LB: loop body
LE: loop exit
PB: predicated region body
PF: predicated region fallthrough
CT: control target
= control target key end

     0   :  { %s438_s18 = smov 0   ;;  %s478_s0 = inlined_call_operand.vmem [shape: f32[2,4,256], index: 0, kind: input, shape index: {}]   ;;  %s479_s1 = inlined_call_operand.vmem [shape: f32[2,1], index: 1, kind: input, shape index: {}]   ;;  %s480_s2 = inlined_call_operand.vmem [shape: f32[2,1], index: 2, kind: input, shape index: {}]   ;;  %s481_s3 = inlined_call_operand.vmem [shape: f32[2,1], index: 3, kind: input, shape index: {}]   ;;  %s482_s4 = inlined_call_operand.vmem [shape: f32[2,1], index: 4, kind: input, shape index: {}]   ;;  %s483_s5 = inlined_call_operand.vmem [shape: f32[2,4,256], index: 5, kind: output, shape index: {}]  }
   0x1 LB: > { %s370_s19 = sadd.s32 4294967295, %s404_s18   ;;  %p374_p0 = scmp.ge.s32.totalorder %s404_s18, 1  ;;  %s404_s18 = sphi %s438_s18, %s15_s18  }
   0x2   : > { %p187_p1 = scmp.lt.s32.totalorder %s404_s18, 3 }
   0x4   : > { %p188_p2 = pnand %p374_p0, %p187_p1 }
   0x5   : > { %p215_p3 = scmp.lt.s32.totalorder (!%p188_p2), %s370_s19, 1 }
   0x6   : > { %191 = sbr.rel (%p188_p2) target bundleno = 319 (0x13f), region = 40 }
   0xb   : > { %s485_s19 = smov (!%p215_p3, %s370_s19), 1  ;;  %vm229_vm0 = vcmask 1041408   ;;  %v284_v10 = vld [vmem:[%s481_s3] sm:$0x3]  ;;  %v406_v11 = vmov 0   ;;  %v263_v15 = vlaneseq }
   0xc   : > { %s381_s20 = sshll.u32 %s485_s19, 3  ;;  %393 = vset.pattern.permute.xlu1 %v406_v11  ;;  %394 = vset.pattern.permute.xlu0 %v406_v11  ;;  %v299_v12 = vld [vmem:[%s482_s4] sm:$0x3]  ;;  %v407_v13 = vmov 839922192  }
   0xd   : > { %s454_s23 = scalar_lea.vmem %s478_s0, %s381_s20  ;;  %287 = vperm.xlu1 %393, %v284_v10   ;;  %v261_v14 = vunpack.c.l.s4 %v407_v13  ;;  %v264_v19 = vshrl.u32 %v263_v15, 7  ;;  %s224_s30 = scalar_lea.vmem %s483_s5, %s381_s20  ;;  %v249_v36 = vld [vmem:[%s479_s1] sm:$0x3] }
   0xe   : > { %v225_v0 = vld [vmem:[%s454_s23] sm:$0x33]  ;;  %v283_v29 = vld [vmem:[%s454_s23] sm:$0xcc] }
   0xf   : > { %v227_v1 = vcombine.high %v225_v0, %v225_v0  ;;  %v230_v2 = vsel %vm229_vm0, %v225_v0, 0.0  ;;  %v235_v3 = vmul.f32 %v225_v0, %v225_v0  ;;  %v262_v18 = vunpack.c.0.s8 %v261_v14  ;;  %v253_v39 = vld [vmem:[%s480_s2] sm:$0x3] }
  0x11   : > { %v231_v4 = vsel %vm229_vm0, %v227_v1, 0.0  ;;  %v237_v5 = vcombine.high %v235_v3, %v235_v3  ;;  %v239_v6 = vsel %vm229_vm0, %v235_v3, 0.0  ;;  %v265_v24 = vsub.s32 %v262_v18, %v264_v19 }
  0x12   : > { %v232_v7 = vadd.f32 %v231_v4, %v230_v2 }
  0x13   : > { %v240_v8 = vsel %vm229_vm0, %v237_v5, 0.0 }
  0x14   : > { %233 = vadd.xlane.f32.xlu0 %v232_v7  ;;  %v241_v9 = vadd.f32 %v240_v8, %v239_v6 }
  0x18   : > { %242 = vadd.xlane.f32.xlu0 %v241_v9 }
  0x2e   : > { %302 = vperm.xlu0 %394, %v299_v12  }
  0x88   : > { %v288_v26 = vpop.permute.xlu1 %287 }
  0x89   : > { %v295_v28 = vrot.slane %v288_v26, %v265_v24 }
  0x8b   : > { %v296_v31 = vrot.slane %v295_v28, 6 }
  0x8d   : > { %v298_v33 = vmul.f32 %v296_v31, %v283_v29 }
  0x9d   : > { %v234_v16 = vpop.xlane.xlu0 %233 }
  0x9e   : > { %v244_v17 = vmul.f32 0.00390625, %v234_v16 }
  0xa0   : > { %v246_v21 = vmul.f32 %v244_v17, %v244_v17 }
  0xa1   : > { %v243_v20 = vpop.xlane.xlu0 %242 }
  0xa2   : > { %v245_v22 = vmul.f32 0.00390625, %v243_v20 }
  0xa4   : > { %v247_v23 = vsub.f32 %v245_v22, %v246_v21 }
  0xa6   : > { %v248_v25 = vmax.f32 %v247_v23, 0.0 }
  0xa8   : > { %v250_v27 = vadd.f32 1e-05, %v248_v25 }
  0xa9   : > { %v303_v30 = vpop.permute.xlu0 %302 }
  0xaa   : > { %396 = vrsqrt.f32 %v250_v27  ;;  %v310_v32 = vrot.slane %v303_v30, %v265_v24 }
  0xac   : > { %v311_v34 = vrot.slane %v310_v32, 6 }
  0xae   : > { %v313_v35 = vadd.f32 %v311_v34, %v298_v33 }
  0xb0   : > { %314 = vst [vmem:[%s224_s30] sm:$0xcc] %v313_v35 }
  0xb7   : > { %v397_v37 = vpop.eup %396 }
  0xb8   : > { %v252_v38 = vmul.f32 %v397_v37, %v249_v36 }
  0xba   : > { %258 = vperm.xlu1 %393, %v252_v38   ;;  %v254_v40 = vmul.f32 %v252_v38, %v244_v17 }
  0xbc   : > { %v255_v41 = vsub.f32 %v253_v39, %v254_v40 }
  0xbe   : > { %271 = vperm.xlu1 %393, %v255_v41  }
 0x135   : > { %v259_v42 = vpop.permute.xlu1 %258 }
 0x136   : > { %v266_v43 = vrot.slane %v259_v42, %v265_v24 }
 0x138   : > { %v268_v45 = vmul.f32 %v266_v43, %v225_v0 }
 0x139   : > { %v272_v44 = vpop.permute.xlu1 %271 }
 0x13a   : > { %v279_v46 = vrot.slane %v272_v44, %v265_v24 }
 0x13c   : > { %v281_v47 = vadd.f32 %v279_v46, %v268_v45 }
 0x13e   : > { %282 = vst [vmem:[%s224_s30] sm:$0x33] %v281_v47 }
 0x13f PF: > { %s15_s18 = sadd.s32 1, %s404_s18  }
 0x140   : > { %p12_p4 = scmp.ge.s32.totalorder %s15_s18, 4  }
 0x142   :  { %14 = sbr.rel (!%p12_p4) target bundleno = 1 (0x1), region = 70 }

</bundles_post_ra>
